<compile_context>
chip_gen: v7x
topology: tpu7x:2x2x1
jax: 0.10.0
libtpu: 0.0.40
codegen_flags: <defaults>
</compile_context>

<pallas_src>
import functools

import jax
import jax.numpy as jnp
from jax import lax
from jax.experimental import pallas as pl
from jax.experimental.pallas import tpu as pltpu

LEAKY_SLOPE = 0.01  # PyTorch nn.LeakyReLU() default negative_slope


def _leaky_relu(x):
    # Single vmax (mul + max) instead of cmp + select; identical for slope < 1.
    return jnp.maximum(x, LEAKY_SLOPE * x)


def critic_kernel(x_ref, w1_ref, b1_ref, w2_ref, b2_ref, w3_ref, b3_ref, o_ref):
    """Fused Critic MLP on one batch tile (all operands VMEM-resident)."""
    # Layer 1: single MXU matmul over the already-concatenated input tile.
    h1 = jnp.dot(x_ref[...], w1_ref[...], preferred_element_type=jnp.float32)
    h1 = _leaky_relu(h1 + b1_ref[...])

    # Layer 2.
    h2 = jnp.dot(h1, w2_ref[...], preferred_element_type=jnp.float32)
    h2 = _leaky_relu(h2 + b2_ref[...])

    # Layer 3 (H2p -> 1): contract w3 (1, H2p) against h2 (tb, H2p) on the MXU
    # so the result is a lane-dense (1, tb) row (no masked (tb, 1) stores).
    out_row = lax.dot_general(
        w3_ref[...], h2, (((1,), (1,)), ((), ())),
        preferred_element_type=jnp.float32)
    out_row = out_row + b3_ref[0, 0]
    o_ref[...] = out_row.astype(o_ref.dtype)[None]   # (1, 1, tb)


@functools.partial(jax.jit, static_argnames=("block_b",))
def critic_forward(encode, action, params, *, block_b=1024):
    """JAX wrapper: batch-tiled, weight-resident fused Pallas MLP."""
    w1, b1, w2, b2, w3, b3 = params
    B, E = encode.shape
    A = action.shape[-1]
    Din = E + A
    H2 = w1.shape[1]

    # ---- lane-friendly hidden width (pad to multiple of 128) --------------
    # Padding with exact zeros is numerically inert through LeakyReLU.
    H2p = max(128, ((H2 + 127) // 128) * 128)
    dh = H2p - H2
    if dh:
        w1 = jnp.pad(w1, ((0, 0), (0, dh)))
        b1 = jnp.pad(b1, ((0, 0), (0, dh)))
        w2 = jnp.pad(w2, ((0, dh), (0, dh)))
        b2 = jnp.pad(b2, ((0, 0), (0, dh)))
        w3 = jnp.pad(w3, ((0, dh), (0, 0)))
    w3_row = w3.T                                     # (1, H2p)

    # Tiny wrapper-side concat so layer 1 is one MXU matmul in the kernel.
    x = jnp.concatenate([encode, action], axis=-1)    # (B, Din)

    # ---- batch tiling ------------------------------------------------------
    # Tile is a multiple of 8 (f32 sublanes); 1024 default amortizes the
    # ~600-cycle per-grid-step overhead while staying well inside VMEM.
    tb = min(block_b, max(8, ((B + 7) // 8) * 8))
    Bp = ((B + tb - 1) // tb) * tb
    if Bp != B:
        x = jnp.pad(x, ((0, Bp - B), (0, 0)))
    num_tiles = Bp // tb

    # TODO(synk): for very large H2 on v7x (64 MiB VMEM), consider
    # pipeline_mode=pl.Buffered(1) on the resident weight specs (esp. W2) to
    # avoid double-buffering constant-index inputs.
    resident = lambda shape: pl.BlockSpec(shape, lambda i: (0,) * len(shape))

    out = pl.pallas_call(
        critic_kernel,
        out_shape=jax.ShapeDtypeStruct((num_tiles, 1, tb), encode.dtype),
        grid=(num_tiles,),
        in_specs=[
            pl.BlockSpec((tb, Din), lambda i: (i, 0)),          # input tile
            resident((Din, H2p)),                               # W1
            resident((1, H2p)),                                 # b1
            resident((H2p, H2p)),                               # W2
            resident((1, H2p)),                                 # b2
            resident((1, H2p)),                                 # w3 row
            pl.BlockSpec(memory_space=pltpu.MemorySpace.SMEM),  # b3 scalar
        ],
        out_specs=pl.BlockSpec((1, 1, tb), lambda i: (i, 0, 0)),
        compiler_params=pltpu.CompilerParams(
            # Batch tiles are independent -> megacore sharding on v7x,
            # neutral on v5e/v6e.
            dimension_semantics=("parallel",),
            # Explicit scoped-VMEM budget (v5e default is only 16 MiB).
            vmem_limit_bytes=32 * 1024 * 1024,
        ),
    )(x, w1, b1, w2, b2, w3_row, b3)

    # (num_tiles, 1, tb) row-major == batch order -> (B, 1)
    return out.reshape(-1, 1)[:B]


def init_critic_params(key, encode_size, hidden_size, dtype=jnp.float32):
    """Deterministic synthetic init (stand-in for models.init_weights)."""
    d_in = encode_size + 2
    h2 = hidden_size * 2
    k1, k2, k3 = jax.random.split(key, 3)

    def xavier(k, fan_in, fan_out):
        limit = jnp.sqrt(6.0 / (fan_in + fan_out))
        return jax.random.uniform(
            k, (fan_in, fan_out), dtype=dtype, minval=-limit, maxval=limit
        )

    w1 = xavier(k1, d_in, h2)
    b1 = jnp.zeros((1, h2), dtype)
    w2 = xavier(k2, h2, h2)
    b2 = jnp.zeros((1, h2), dtype)
    w3 = xavier(k3, h2, 1)
    b3 = jnp.zeros((1, 1), dtype)
    return (w1, b1, w2, b2, w3, b3)


def critic_reference(encode, action, params):
    """Pure-JAX reference for correctness checking."""
    w1, b1, w2, b2, w3, b3 = params
    x = jnp.concatenate([encode, action], axis=-1)
    h1 = jnp.maximum(x @ w1 + b1, LEAKY_SLOPE * (x @ w1 + b1))
    h2 = jnp.maximum(h1 @ w2 + b2, LEAKY_SLOPE * (h1 @ w2 + b2))
    return h2 @ w3 + b3


if __name__ == "__main__":
    # Shapes consistent with the module: args.encode_size=30, args.hidden_size=32
    ENCODE_SIZE = 30
    HIDDEN_SIZE = 32
    BATCH = 8

    key = jax.random.PRNGKey(0)
    k_enc, k_act, k_par = jax.random.split(key, 3)

    encode = jax.random.normal(k_enc, (BATCH, ENCODE_SIZE), jnp.float32)
    action = jax.random.normal(k_act, (BATCH, 2), jnp.float32)
    params = init_critic_params(k_par, ENCODE_SIZE, HIDDEN_SIZE)

    out = critic_forward(encode, action, params)
    out = jax.block_until_ready(out)

    ref = critic_reference(encode, action, params)
    assert out.shape == (BATCH, 1), out.shape
    max_err = float(jnp.max(jnp.abs(out - ref)))
    # Small tolerance for MXU vs XLA reduction-order differences (all f32).
    assert jnp.allclose(out, ref, atol=2e-4, rtol=2e-4), (
        f"mismatch vs reference: max abs err = {max_err}"
    )

    print("KERNEL_OK")
</pallas_src>

<mosaic_0001>
module attributes {stable_mosaic.version = 11 : i64} {
  func.func @critic_kernel(%arg0: i32, %arg1: memref<8x32xf32, #tpu.memory_space<vmem>>, %arg2: memref<32x128xf32, #tpu.memory_space<vmem>>, %arg3: memref<1x128xf32, #tpu.memory_space<vmem>>, %arg4: memref<128x128xf32, #tpu.memory_space<vmem>>, %arg5: memref<1x128xf32, #tpu.memory_space<vmem>>, %arg6: memref<1x128xf32, #tpu.memory_space<vmem>>, %arg7: memref<1x1xf32, #tpu.memory_space<smem>>, %arg8: memref<1x1x8xf32, #tpu.memory_space<vmem>>) attributes {dimension_semantics = [#tpu.dimension_semantics<parallel>], iteration_bounds = array<i64: 1>, scalar_prefetch = 0 : i64, scratch_operands = 0 : i64, tpu.core_type = #tpu.core_type<tc>, window_params = [{transform_indices = @transform_0, window_bounds = array<i64: 8, 32>}, {pipeline_mode = #tpu.pipeline_mode<synchronous>, transform_indices = @transform_1, window_bounds = array<i64: 32, 128>}, {pipeline_mode = #tpu.pipeline_mode<synchronous>, transform_indices = @transform_2, window_bounds = array<i64: 1, 128>}, {pipeline_mode = #tpu.pipeline_mode<synchronous>, transform_indices = @transform_3, window_bounds = array<i64: 128, 128>}, {pipeline_mode = #tpu.pipeline_mode<synchronous>, transform_indices = @transform_4, window_bounds = array<i64: 1, 128>}, {pipeline_mode = #tpu.pipeline_mode<synchronous>, transform_indices = @transform_5, window_bounds = array<i64: 1, 128>}, {transform_indices = @transform_6, window_bounds = array<i64: 1, 1>}, {transform_indices = @transform_7, window_bounds = array<i64: 1, 1, 8>}]} {
    %c0 = arith.constant 0 : index
    %c0_0 = arith.constant 0 : index
    %0 = vector.load %arg1[%c0, %c0_0] : memref<8x32xf32, #tpu.memory_space<vmem>>, vector<8x32xf32>
    %c0_1 = arith.constant 0 : index
    %c0_2 = arith.constant 0 : index
    %1 = vector.load %arg2[%c0_1, %c0_2] : memref<32x128xf32, #tpu.memory_space<vmem>>, vector<32x128xf32>
    %cst = arith.constant dense<0.000000e+00> : vector<8x128xf32>
    %2 = tpu.matmul %0, %1, %cst {dimension_numbers = #tpu.dot_dimension_numbers<[1], [0], [0], [1], [0, 0, 1, 1], [], []>} : vector<8x32xf32>, vector<32x128xf32>, vector<8x128xf32> -> vector<8x128xf32>
    %c0_3 = arith.constant 0 : index
    %c0_4 = arith.constant 0 : index
    %3 = vector.load %arg3[%c0_3, %c0_4] : memref<1x128xf32, #tpu.memory_space<vmem>>, vector<1x128xf32>
    %4 = vector.broadcast %3 : vector<1x128xf32> to vector<8x128xf32>
    %5 = arith.addf %2, %4 : vector<8x128xf32>
    %cst_5 = arith.constant 0.00999999977 : f32
    %6 = vector.broadcast %cst_5 : f32 to vector<8x128xf32>
    %7 = arith.mulf %6, %5 : vector<8x128xf32>
    %8 = arith.maximumf %5, %7 : vector<8x128xf32>
    %c0_6 = arith.constant 0 : index
    %c0_7 = arith.constant 0 : index
    %9 = vector.load %arg4[%c0_6, %c0_7] : memref<128x128xf32, #tpu.memory_space<vmem>>, vector<128x128xf32>
    %cst_8 = arith.constant dense<0.000000e+00> : vector<8x128xf32>
    %10 = tpu.matmul %8, %9, %cst_8 {dimension_numbers = #tpu.dot_dimension_numbers<[1], [0], [0], [1], [0, 0, 1, 1], [], []>} : vector<8x128xf32>, vector<128x128xf32>, vector<8x128xf32> -> vector<8x128xf32>
    %c0_9 = arith.constant 0 : index
    %c0_10 = arith.constant 0 : index
    %11 = vector.load %arg5[%c0_9, %c0_10] : memref<1x128xf32, #tpu.memory_space<vmem>>, vector<1x128xf32>
    %12 = vector.broadcast %11 : vector<1x128xf32> to vector<8x128xf32>
    %13 = arith.addf %10, %12 : vector<8x128xf32>
    %cst_11 = arith.constant 0.00999999977 : f32
    %14 = vector.broadcast %cst_11 : f32 to vector<8x128xf32>
    %15 = arith.mulf %14, %13 : vector<8x128xf32>
    %16 = arith.maximumf %13, %15 : vector<8x128xf32>
    %c0_12 = arith.constant 0 : index
    %c0_13 = arith.constant 0 : index
    %17 = vector.load %arg6[%c0_12, %c0_13] : memref<1x128xf32, #tpu.memory_space<vmem>>, vector<1x128xf32>
    %cst_14 = arith.constant dense<0.000000e+00> : vector<1x8xf32>
    %18 = tpu.matmul %17, %16, %cst_14 {dimension_numbers = #tpu.dot_dimension_numbers<[1], [1], [0], [0], [0, 0, 1, 0], [], []>} : vector<1x128xf32>, vector<8x128xf32>, vector<1x8xf32> -> vector<1x8xf32>
    %c0_15 = arith.constant 0 : index
    %c0_16 = arith.constant 0 : index
    %19 = memref.load %arg7[%c0_15, %c0_16] : memref<1x1xf32, #tpu.memory_space<smem>>
    %20 = vector.broadcast %19 : f32 to vector<1x8xf32>
    %21 = arith.addf %18, %20 : vector<1x8xf32>
    %22 = vector.shape_cast %21 : vector<1x8xf32> to vector<1x1x8xf32>
    %c0_17 = arith.constant 0 : index
    %c0_18 = arith.constant 0 : index
    %c0_19 = arith.constant 0 : index
    %23 = vector.load %arg8[%c0_17, %c0_18, %c0_19] : memref<1x1x8xf32, #tpu.memory_space<vmem>>, vector<1x1x8xf32>
    tpu.vector_store %arg8[%c0_17, %c0_18, %c0_19], %22 {strides = array<i32>} : memref<1x1x8xf32, #tpu.memory_space<vmem>>, vector<1x1x8xf32>,
    return
  }
  func.func @transform_0(%arg0: i32) -> (i32, i32) {
    %c0_i32 = arith.constant 0 : i32
    %c0_i32_0 = arith.constant 0 : i32
    return %arg0, %c0_i32 : i32, i32
  }
  func.func @transform_1(%arg0: i32) -> (i32, i32) {
    %c0_i32 = arith.constant 0 : i32
    %c0_i32_0 = arith.constant 0 : i32
    %c0_i32_1 = arith.constant 0 : i32
    return %c0_i32, %c0_i32_0 : i32, i32
  }
  func.func @transform_2(%arg0: i32) -> (i32, i32) {
    %c0_i32 = arith.constant 0 : i32
    %c0_i32_0 = arith.constant 0 : i32
    %c0_i32_1 = arith.constant 0 : i32
    return %c0_i32, %c0_i32_0 : i32, i32
  }
  func.func @transform_3(%arg0: i32) -> (i32, i32) {
    %c0_i32 = arith.constant 0 : i32
    %c0_i32_0 = arith.constant 0 : i32
    %c0_i32_1 = arith.constant 0 : i32
    return %c0_i32, %c0_i32_0 : i32, i32
  }
  func.func @transform_4(%arg0: i32) -> (i32, i32) {
    %c0_i32 = arith.constant 0 : i32
    %c0_i32_0 = arith.constant 0 : i32
    %c0_i32_1 = arith.constant 0 : i32
    return %c0_i32, %c0_i32_0 : i32, i32
  }
  func.func @transform_5(%arg0: i32) -> (i32, i32) {
    %c0_i32 = arith.constant 0 : i32
    %c0_i32_0 = arith.constant 0 : i32
    %c0_i32_1 = arith.constant 0 : i32
    return %c0_i32, %c0_i32_0 : i32, i32
  }
  func.func @transform_6(%arg0: i32) -> (i32, i32) {
    %c0_i32 = arith.constant 0 : i32
    %c0_i32_0 = arith.constant 0 : i32
    %c0_i32_1 = arith.constant 0 : i32
    return %c0_i32, %c0_i32_0 : i32, i32
  }
  func.func @transform_7(%arg0: i32) -> (i32, i32, i32) {
    %c0_i32 = arith.constant 0 : i32
    %c0_i32_0 = arith.constant 0 : i32
    %c0_i32_1 = arith.constant 0 : i32
    return %arg0, %c0_i32, %c0_i32_0 : i32, i32, i32
  }
}

</mosaic_0001>

<bundles_post_ra>
// kernel: critic_forward.1
= control target key start
LH: loop header
LB: loop body
LE: loop exit
PB: predicated region body
PF: predicated region fallthrough
CT: control target
= control target key end

     0   :  { %v436_v3 = vmov 0.0|0.0   ;;  %vm437_vm0 = vmmov 0   ;;  %v438_v6 = vmov 0.0   ;;  %s570_s0 = inlined_call_operand.vmem [shape: f32[8,32], index: 0, kind: input, shape index: {}]   ;;  %s571_s1 = inlined_call_operand.vmem [shape: f32[32,128], index: 1, kind: input, shape index: {}]   ;;  %s572_s2 = inlined_call_operand.vmem [shape: f32[1,128], index: 2, kind: input, shape index: {}]   ;;  %s573_s3 = inlined_call_operand.vmem [shape: f32[128,128], index: 3, kind: input, shape index: {}]   ;;  %s574_s4 = inlined_call_operand.vmem [shape: f32[1,128], index: 4, kind: input, shape index: {}]   ;;  %s575_s5 = inlined_call_operand.vmem [shape: f32[1,128], index: 5, kind: input, shape index: {}]   ;;  %s576_s6 = inlined_call_operand.<no memory space> [shape: f32[1,1], index: 6, kind: input, shape index: {}]   ;;  %s577_s7 = inlined_call_operand.hbm [shape: f32[1,1,8], index: 7, kind: output, shape index: {}]  }
   0x1   :  { %v29_v0 = vld [vmem:[%s571_s1] sm:$0xff]  ;;  %v30_v1 = vld [vmem:[%s571_s1 + $0x8] sm:$0xff]  ;;  %v31_v2 = vld [vmem:[%s571_s1 + $0x10] sm:$0xff]  ;;  %378 = vmatprep.subr.bf16.mxu0 %v436_v3  ;;  %335 = vmatprep.mubr.msk.f32.mxu0 %vm437_vm0, %v438_v6 }
   0x2   :  { %v379_v4 = vpack.c.bf16 %v30_v1, %v29_v0  ;;  %v32_v5 = vld [vmem:[%s571_s1 + $0x18] sm:$0xff]  ;;  %v116_v7 = vld [vmem:[%s573_s3] sm:$0xff]  ;;  %384 = vmatprep.subr.bf16.mxu1 %v436_v3  ;;  %v117_v8 = vld [vmem:[%s573_s3 + $0x8] sm:$0xff]  ;;  %370 = vmatprep.mubr.msk.f32.mxu1 %vm437_vm0, %v438_v6 }
   0x3   :  { %v118_v9 = vld [vmem:[%s573_s3 + $0x10] sm:$0xff]  ;;  %v119_v10 = vld [vmem:[%s573_s3 + $0x18] sm:$0xff]  ;;  %v382_v11 = vpack.c.bf16 %v32_v5, %v31_v2  ;;  %v385_v12 = vpack.c.bf16 %v117_v8, %v116_v7  ;;  %v120_v14 = vld [vmem:[%s573_s3 + $0x20] sm:$0xff] }
   0x4   :  { %380 = vmatpush3.bf16.msra.mxu0 %v379_v4  ;;  %v388_v13 = vpack.c.bf16 %v119_v10, %v118_v9  ;;  %v121_v15 = vld [vmem:[%s573_s3 + $0x28] sm:$0xff] }
   0x5   :  { %381 = vmatprep.subr.bf16.mxu0 %v436_v3  ;;  %386 = vmatpush3.bf16.msra.mxu1 %v385_v12 }
   0x6   :  { %387 = vmatprep.subr.bf16.mxu1 %v436_v3 }
   0x7   :  { %13 = vsyncpa [#allocation4], 0  ;;  %v28_v16 = vld [vmem:[%s570_s0] sm:$0xff]  ;;  %vm40_vm1 = vcmask 261120   ;;  %v391_v17 = vpack.c.bf16 %v121_v15, %v120_v14  ;;  %v122_v18 = vld [vmem:[%s573_s3 + $0x30] sm:$0xff]  ;;  %v213_v46 = vstv %s576_s6  ;;  %s439_s23 = smov [#allocation3]  }
   0x8   :  { %383 = vmatpush3.bf16.msra.mxu0 %v382_v11  ;;  %v123_v19 = vld [vmem:[%s573_s3 + $0x38] sm:$0xff]  ;;  %v124_v21 = vld [vmem:[%s573_s3 + $0x40] sm:$0xff]  ;;  %v125_v22 = vld [vmem:[%s573_s3 + $0x48] sm:$0xff]  ;;  %s292_s24 = sshll.u32 %s439_s23, 4  ;;  %vm284_vm2 = vcmask 57344   ;;  %s293_s24 = int_to_ptr.vmem [resolvable:$true] %s292_s24 }
   0x9   :  { %373 = vmatprep.subr.mxu0 %v438_v6  ;;  %389 = vmatpush3.bf16.msra.mxu1 %v388_v13  ;;  %v394_v20 = vpack.c.bf16 %v123_v19, %v122_v18  ;;  %v397_v23 = vpack.c.bf16 %v125_v22, %v124_v21  ;;  %v126_v24 = vld [vmem:[%s573_s3 + $0x50] sm:$0xff]  ;;  %v127_v25 = vld [vmem:[%s573_s3 + $0x58] sm:$0xff]  ;;  %v128_v27 = vld [vmem:[%s573_s3 + $0x60] sm:$0xff]  ;;  %s416_s25 = scalar_lea.vmem %s293_s24, 32  ;;  %p417_p1 = scmp.lt.s32.totalorder %s293_s24, %s293_s24 }
   0xa   :  { %390 = vmatprep.subr.bf16.mxu1 %v436_v3  ;;  %v400_v26 = vpack.c.bf16 %v127_v25, %v126_v24  ;;  %v129_v28 = vld [vmem:[%s573_s3 + $0x68] sm:$0xff]  ;;  %v130_v30 = vld [vmem:[%s573_s3 + $0x70] sm:$0xff]  ;;  %v131_v31 = vld [vmem:[%s573_s3 + $0x78] sm:$0xff] }
   0xb   :  { %336 = vmatmul.mubr.msk.f32.vlgmr.msra.gmra.mrb[0].mxu0 %vm40_vm1, %v28_v16  ;;  %v403_v29 = vpack.c.bf16 %v129_v28, %v128_v27  ;;  %v406_v32 = vpack.c.bf16 %v131_v31, %v130_v30  ;;  %v300_v33 = vld [vmem:[%s572_s2] ss:$0 sm:$0xff] }
   0xc   :  { %375 = vmatprep.mubr.msk.f32.mxu0 %vm437_vm0, %v438_v6  ;;  %v302_v39 = vld [vmem:[%s574_s4] ss:$0 sm:$0xff]  ;;  %s412_s4 = scalar_lea.vmem %s293_s24, 16 }
   0xd   :  { %392 = vmatpush3.bf16.msra.mxu1 %v391_v17  ;;  %v211_v45 = vld [vmem:[%s575_s5] sm:$0x1]  ;;  %p413_p0 = scmp.ne.s32.totalorder %s293_s24, %s412_s4  ;;  %p418_p2 = scmp.lt.s32.totalorder %s416_s25, %s412_s4 }
   0xe   :  { %393 = vmatprep.subr.bf16.mxu1 %v436_v3 }
   0xf   :  { %p419_p3 = por %p418_p2, %p417_p1 }
  0x11   :  { %395 = vmatpush3.bf16.msra.mxu1 %v394_v20  ;;  %p420_p4 = pnand %p419_p3, %p413_p0 }
  0x12   :  { %396 = vmatprep.subr.bf16.mxu1 %v436_v3 }
  0x15   :  { %398 = vmatpush3.bf16.msra.mxu1 %v397_v23 }
  0x16   :  { %399 = vmatprep.subr.bf16.mxu1 %v436_v3 }
  0x19   :  { %401 = vmatpush3.bf16.msra.mxu1 %v400_v26 }
  0x1a   :  { %402 = vmatprep.subr.bf16.mxu1 %v436_v3 }
  0x1d   :  { %404 = vmatpush3.bf16.msra.mxu1 %v403_v29 }
  0x1e   :  { %405 = vmatprep.subr.bf16.mxu1 %v436_v3 }
  0x21   :  { %407 = vmatpush3.bf16.msra.mxu1 %v406_v32 }
  0xde   :  { %v110_v34 = vpop.f32.mrb[0].mxu0 }
  0xdf   :  { %v111_v35 = vadd.f32 %v300_v33, %v110_v34  ;;  %v337_v36 = vpop.f32.mrb[1].mxu0 }
  0xe1   :  { %v114_v37 = vmul.f32 0.01, %v111_v35 }
  0xe3   :  { %v115_v38 = vmax.f32 %v111_v35, %v114_v37 }
  0xe5   :  { %371 = vmatmul.mubr.f32.vlgmr.msra.gmra.mrb[0].mxu1 %v115_v38 }
 0x1b8   :  { %v205_v40 = vpop.f32.mrb[0].mxu1 }
 0x1b9   :  { %v206_v41 = vadd.f32 %v302_v39, %v205_v40  ;;  %v372_v42 = vpop.f32.mrb[1].mxu1 }
 0x1bb   :  { %v209_v43 = vmul.f32 0.01, %v206_v41 }
 0x1bd   :  { %v210_v44 = vmax.f32 %v206_v41, %v209_v43 }
 0x1bf   :  { %374 = vmatpush3.xpose.msra.mxu0 %v210_v44 }
 0x1c2   :  { %376 = vmatmul.mubr.f32.vlgmr.msra.gmra.mrb[2].mxu0 %v211_v45 }
 0x295   :  { %v280_v47 = vpop.f32.mrb[2].mxu0 }
 0x296   :  { %v281_v48 = vadd.f32 %v280_v47, %v213_v46  ;;  %v377_v49 = vpop.f32.mrb[3].mxu0 }
 0x298   :  { %285 = vst.msk [vmem:[#allocation3] sm:$0x1] %vm284_vm2, %v281_v48 }
 0x299   :  { %423 = shalt.err (!%p420_p4)
}
 0x29a   :  { %s424_s6 = scalar_lea.hbm %s577_s7, 16 }
 0x29b   :  { %p425_p5 = scmp.ne.s32.totalorder %s577_s7, %s424_s6  ;;  %p428_p6 = scmp.lt.u32.totalorder %s424_s6, %s577_s7 }
 0x29d   :  { %p430_p7 = pnand %p428_p6, %p425_p5 }
 0x29f   :  { %433 = shalt.err (!%p430_p7)
}
 0x2a0   :  { %295 = dma.vmem_to_hbm [thread:$0]  %s293_s24, 16, %s577_s7, [#allocation4]  }
 0x2a1   :  { %434 = dma.done.wait [#allocation4], 16  }
 0x2a2   :  { %435 = vsyncadd [#allocation4], 4294967280 }
 0x2a3   :  { %299 = vsyncpa [#allocation4], 1 }

</bundles_post_ra>
